<compile_context>
chip_gen: v7x
topology: tpu7x:2x2x1
jax: 0.10.0
libtpu: 0.0.40
codegen_flags: <defaults>
</compile_context>

<pallas_src>
import math

import jax
import jax.numpy as jnp
from jax.experimental import pallas as pl
from jax.experimental.pallas import tpu as pltpu

N_MAX_POSITIONS = 1024

_LANE = 128
_TARGET_BLOCK_BYTES = 2 * 1024 * 1024      # ~85%+ of HBM roofline per the tile sweep
_VMEM_LIMIT_BYTES = 32 * 1024 * 1024       # safe scoped limit on v5e/v6e/v7x


def _make_pe_table(d_model: int, max_len: int = N_MAX_POSITIONS) -> jnp.ndarray:
    """Deterministic sinusoidal table, shape [max_len, d_model] (== torch pe[:, 0, :])."""
    position = jnp.arange(max_len, dtype=jnp.float32)[:, None]            # [L, 1]
    div_term = jnp.exp(
        jnp.arange(0, d_model, 2, dtype=jnp.float32)
        * (-math.log(10000.0) / d_model)
    )                                                                     # [D/2]
    pe = jnp.zeros((max_len, d_model), dtype=jnp.float32)
    pe = pe.at[:, 0::2].set(jnp.sin(position * div_term))
    pe = pe.at[:, 1::2].set(jnp.cos(position * div_term))
    return pe


def _largest_divisor_leq(n: int, cap: int) -> int:
    """Largest divisor of n that is <= cap (cap clamped to [1, n])."""
    cap = max(1, min(n, cap))
    for d in range(cap, 0, -1):
        if n % d == 0:
            return d
    return 1


def _sublane_multiple(itemsize: int) -> int:
    """Sublane tiling multiple for a dtype: 8 (f32), 16 (bf16), 32 (int8/fp8)."""
    return max(8, 8 * (4 // max(1, itemsize)))


def _round_up(x: int, m: int) -> int:
    return ((x + m - 1) // m) * m


def _padded_tile_bytes(rows: int, cols: int, itemsize: int) -> int:
    """VMEM footprint of a trailing (rows, cols) tile after (sublane, lane) padding."""
    return _round_up(rows, _sublane_multiple(itemsize)) * _round_up(cols, _LANE) * itemsize


def _add_pe_kernel(x_ref, pe_ref, o_ref):
    # Shapes per path (pe broadcasts against x where they differ):
    #   dense batch_first : (1, tile_r, C)      + (1, tile_r, C)
    #   flat  batch_first : (tile_b, tile_cols) + (1, tile_cols)
    #   seq_first         : (tile_s, B, D)      + (tile_s, 1, D)
    o_ref[...] = (x_ref[...] + pe_ref[...]).astype(o_ref.dtype)


def _forward_batch_first_dense(x: jnp.ndarray, pe_table: jnp.ndarray) -> jnp.ndarray:
    """x [B,S,D] with S*D divisible by sublane*128: zero-padding tiles."""
    B, S, D = x.shape
    SD = S * D
    itemsize = jnp.dtype(x.dtype).itemsize
    sub = _sublane_multiple(itemsize)

    # Factor S*D = R * C with C a multiple of 128 lanes and R a multiple of
    # the sublane tile, so every block is fully (sublane, lane)-dense.
    q = SD // (_LANE * sub)
    C = _LANE * _largest_divisor_leq(q, 16)        # 128..2048 lanes
    R = SD // C                                    # multiple of `sub`

    budget_units = max(1, _TARGET_BLOCK_BYTES // (sub * C * itemsize))
    tile_r = sub * _largest_divisor_leq(R // sub, budget_units)

    x3 = x.reshape(B, R, C)                                        # free view
    pe3 = pe_table[:S, :].astype(x.dtype).reshape(1, R, C)

    # Batch innermost -> pe block index is constant over the inner axis, so
    # Pallas fetches each pe block once (total pe HBM traffic = S*D bytes).
    grid = (R // tile_r, B)
    blk = (1, tile_r, C)

    out = pl.pallas_call(
        _add_pe_kernel,
        out_shape=jax.ShapeDtypeStruct((B, R, C), x.dtype),
        grid_spec=pltpu.PrefetchScalarGridSpec(
            num_scalar_prefetch=0,
            grid=grid,
            in_specs=[
                pl.BlockSpec(blk, lambda r, b: (b, r, 0)),
                pl.BlockSpec(blk, lambda r, b: (0, r, 0)),
            ],
            out_specs=pl.BlockSpec(blk, lambda r, b: (b, r, 0)),
        ),
        compiler_params=pltpu.CompilerParams(
            dimension_semantics=("parallel", "parallel"),
            vmem_limit_bytes=_VMEM_LIMIT_BYTES,
        ),
    )(x3, pe3)
    return out.reshape(B, S, D)


def _forward_batch_first_flat(x: jnp.ndarray, pe_table: jnp.ndarray) -> jnp.ndarray:
    """Fallback for shapes that don't factor densely: x viewed as [B, S*D]."""
    B, S, D = x.shape
    SD = S * D
    itemsize = jnp.dtype(x.dtype).itemsize
    sub = _sublane_multiple(itemsize)

    x2 = x.reshape(B, SD)                                          # free view
    pe2 = pe_table[:S, :].astype(x.dtype).reshape(1, SD)

    # Batch (sublane) tile: a multiple-of-`sub` divisor when possible, else
    # the full extent (legal; padding is accounted for below).
    if B % sub == 0:
        tile_b = sub * _largest_divisor_leq(B // sub, 16)
    else:
        tile_b = B

    # Column (lane) tile: multiple of 128 dividing SD, sized so the *padded*
    # double-buffered x/out/pe blocks stay well under the scoped-VMEM limit.
    if SD % _LANE == 0:
        pad_b = _round_up(tile_b, sub)
        per_lane_unit = (2 * pad_b + sub) * _LANE * itemsize       # x + out + pe per 128 cols
        budget_units = max(1, (_VMEM_LIMIT_BYTES // 2) // (2 * per_lane_unit))
        target_units = max(1, _TARGET_BLOCK_BYTES // (pad_b * _LANE * itemsize))
        tile_cols = _LANE * _largest_divisor_leq(SD // _LANE, min(budget_units, target_units))
    else:
        tile_cols = SD                                             # full extent fallback

    # Batch innermost -> pe block reused across it.
    grid = (SD // tile_cols, B // tile_b)

    out = pl.pallas_call(
        _add_pe_kernel,
        out_shape=jax.ShapeDtypeStruct((B, SD), x.dtype),
        grid_spec=pltpu.PrefetchScalarGridSpec(
            num_scalar_prefetch=0,
            grid=grid,
            in_specs=[
                pl.BlockSpec((tile_b, tile_cols), lambda c, b: (b, c)),
                pl.BlockSpec((1, tile_cols), lambda c, b: (0, c)),
            ],
            out_specs=pl.BlockSpec((tile_b, tile_cols), lambda c, b: (b, c)),
        ),
        compiler_params=pltpu.CompilerParams(
            dimension_semantics=("parallel", "parallel"),
            vmem_limit_bytes=_VMEM_LIMIT_BYTES,
        ),
    )(x2, pe2)
    return out.reshape(B, S, D)


def _forward_seq_first(x: jnp.ndarray, pe_table: jnp.ndarray) -> jnp.ndarray:
    """Native [S, B, D] layout — no wrapper transpose (would add 2x HBM traffic)."""
    S, B, D = x.shape
    itemsize = jnp.dtype(x.dtype).itemsize

    pe_slice = pe_table[:S, :].astype(x.dtype).reshape(S, 1, D)

    # Per-seq-row VMEM footprint after (sublane, lane) padding of the trailing
    # (B, D) / (1, D) tiles; size tile_s so double-buffered x/out/pe fit easily.
    x_row = _padded_tile_bytes(B, D, itemsize)
    pe_row = _padded_tile_bytes(1, D, itemsize)
    budget_rows = max(1, (_VMEM_LIMIT_BYTES // 2) // (2 * (2 * x_row + pe_row)))
    target_rows = max(1, _TARGET_BLOCK_BYTES // x_row)
    tile_s = _largest_divisor_leq(S, min(budget_rows, target_rows))

    grid = (S // tile_s,)
    out = pl.pallas_call(
        _add_pe_kernel,
        out_shape=jax.ShapeDtypeStruct((S, B, D), x.dtype),
        grid_spec=pltpu.PrefetchScalarGridSpec(
            num_scalar_prefetch=0,
            grid=grid,
            in_specs=[
                pl.BlockSpec((tile_s, B, D), lambda s: (s, 0, 0)),
                pl.BlockSpec((tile_s, 1, D), lambda s: (s, 0, 0)),
            ],
            out_specs=pl.BlockSpec((tile_s, B, D), lambda s: (s, 0, 0)),
        ),
        compiler_params=pltpu.CompilerParams(
            dimension_semantics=("parallel",),
            vmem_limit_bytes=_VMEM_LIMIT_BYTES,
        ),
    )(x, pe_slice)
    return out


def sinusoidal_pe_forward(x: jnp.ndarray,
                          pe_table: jnp.ndarray,
                          batch_first: bool = True) -> jnp.ndarray:
    """Forward pass of SinusoidalPE (eval mode: dropout = identity).

    x: [B, S, D] if batch_first else [S, B, D]
    pe_table: [max_len, D] sinusoidal table from _make_pe_table.
    """
    seq_len = x.shape[1] if batch_first else x.shape[0]
    if seq_len > pe_table.shape[0]:
        raise ValueError(
            f"sequence length {seq_len} exceeds pe table max_len {pe_table.shape[0]}")
    if x.shape[-1] != pe_table.shape[1]:
        raise ValueError(
            f"d_model mismatch: x has {x.shape[-1]}, pe table has {pe_table.shape[1]}")

    if batch_first:
        B, S, D = x.shape
        sub = _sublane_multiple(jnp.dtype(x.dtype).itemsize)
        if (S * D) % (_LANE * sub) == 0:
            return _forward_batch_first_dense(x, pe_table)
        return _forward_batch_first_flat(x, pe_table)
    return _forward_seq_first(x, pe_table)


if __name__ == "__main__":
    key = jax.random.PRNGKey(0)
    k0, k1, k2 = jax.random.split(key, 3)

    # --- batch_first=True, small d_model (flattened fallback path) ---
    B, S, D = 2, 8, 32
    pe_small = _make_pe_table(D, max_len=N_MAX_POSITIONS)
    x_bf = jax.random.normal(k0, (B, S, D), dtype=jnp.float32)
    y_bf = jax.block_until_ready(sinusoidal_pe_forward(x_bf, pe_small, batch_first=True))
    ref_bf = x_bf + pe_small[:S, :][None, :, :]
    assert jnp.allclose(y_bf, ref_bf, atol=1e-6), "batch_first (flat) mismatch vs reference"

    # --- batch_first=True, S*D divisible by 1024 (fully dense path) ---
    B2, S2, D2 = 2, 16, 128
    pe_big = _make_pe_table(D2, max_len=N_MAX_POSITIONS)
    x_d = jax.random.normal(k1, (B2, S2, D2), dtype=jnp.float32)
    y_d = jax.block_until_ready(sinusoidal_pe_forward(x_d, pe_big, batch_first=True))
    ref_d = x_d + pe_big[:S2, :][None, :, :]
    assert jnp.allclose(y_d, ref_d, atol=1e-6), "batch_first (dense) mismatch vs reference"

    # --- batch_first=False, native [S, B, D] layout ---
    x_sf = jax.random.normal(k2, (S, B, D), dtype=jnp.float32)
    y_sf = jax.block_until_ready(sinusoidal_pe_forward(x_sf, pe_small, batch_first=False))
    ref_sf = x_sf + pe_small[:S, :][:, None, :]
    assert jnp.allclose(y_sf, ref_sf, atol=1e-6), "seq_first mismatch vs reference"

    print("KERNEL_OK")
</pallas_src>

<mosaic_0001>
module attributes {stable_mosaic.version = 11 : i64} {
  func.func @_add_pe_kernel(%arg0: i32, %arg1: i32, %arg2: memref<2x256xf32, #tpu.memory_space<vmem>>, %arg3: memref<1x256xf32, #tpu.memory_space<vmem>>, %arg4: memref<2x256xf32, #tpu.memory_space<vmem>>) attributes {dimension_semantics = [#tpu.dimension_semantics<parallel>, #tpu.dimension_semantics<parallel>], iteration_bounds = array<i64: 1, 1>, scalar_prefetch = 0 : i64, scratch_operands = 0 : i64, tpu.core_type = #tpu.core_type<tc>, window_params = [{transform_indices = @transform_0, window_bounds = array<i64: 2, 256>}, {transform_indices = @transform_1, window_bounds = array<i64: 1, 256>}, {transform_indices = @transform_2, window_bounds = array<i64: 2, 256>}]} {
    %c0 = arith.constant 0 : index
    %c0_0 = arith.constant 0 : index
    %0 = vector.load %arg2[%c0, %c0_0] : memref<2x256xf32, #tpu.memory_space<vmem>>, vector<2x256xf32>
    %c0_1 = arith.constant 0 : index
    %c0_2 = arith.constant 0 : index
    %1 = vector.load %arg3[%c0_1, %c0_2] : memref<1x256xf32, #tpu.memory_space<vmem>>, vector<1x256xf32>
    %2 = vector.broadcast %1 : vector<1x256xf32> to vector<2x256xf32>
    %3 = arith.addf %0, %2 : vector<2x256xf32>
    %c0_3 = arith.constant 0 : index
    %c0_4 = arith.constant 0 : index
    %4 = vector.load %arg4[%c0_3, %c0_4] : memref<2x256xf32, #tpu.memory_space<vmem>>, vector<2x256xf32>
    tpu.vector_store %arg4[%c0_3, %c0_4], %3 {strides = array<i32>} : memref<2x256xf32, #tpu.memory_space<vmem>>, vector<2x256xf32>,
    return
  }
  func.func @transform_0(%arg0: i32, %arg1: i32) -> (i32, i32) {
    %c0_i32 = arith.constant 0 : i32
    return %arg1, %arg0 : i32, i32
  }
  func.func @transform_1(%arg0: i32, %arg1: i32) -> (i32, i32) {
    %c0_i32 = arith.constant 0 : i32
    %c0_i32_0 = arith.constant 0 : i32
    return %c0_i32, %arg0 : i32, i32
  }
  func.func @transform_2(%arg0: i32, %arg1: i32) -> (i32, i32) {
    %c0_i32 = arith.constant 0 : i32
    return %arg1, %arg0 : i32, i32
  }
}

</mosaic_0001>

<bundles_post_ra>
// kernel: tpu_custom_call.1
= control target key start
LH: loop header
LB: loop body
LE: loop exit
PB: predicated region body
PF: predicated region fallthrough
CT: control target
= control target key end

     0   :  { %7 = vsyncpa [#allocation3], 0  ;;  %s157_s0 = inlined_call_operand.hbm [shape: f32[2,256], index: 0, kind: input, shape index: {}]   ;;  %s158_s1 = inlined_call_operand.vmem [shape: f32[1,256], index: 1, kind: input, shape index: {}]   ;;  %s159_s2 = inlined_call_operand.hbm [shape: f32[2,256], index: 2, kind: output, shape index: {}]  }
   0x1   :  { %8 = vsyncpa [#allocation4], 0  ;;  %s112_s9 = smov [#allocation2]   ;;  %s64_s13 = scalar_lea.hbm %s157_s0, 64 }
   0x2   :  { %s15_s10 = sshll.u32 %s112_s9, 4  ;;  %p65_p0 = scmp.ne.s32.totalorder %s157_s0, %s64_s13  ;;  %s16_s10 = int_to_ptr.vmem [resolvable:$true] %s15_s10 }
   0x3   :  { %p68_p1 = scmp.lt.u32.totalorder %s64_s13, %s157_s0 }
   0x5   :  { %p70_p2 = pnand %p68_p1, %p65_p0 }
   0x7   :  { %73 = shalt.err (!%p70_p2)
}
   0x8   :  { %s74_s18 = scalar_lea.vmem %s16_s10, 64  ;;  %p79_p4 = scmp.lt.s32.totalorder %s16_s10, %s16_s10 }
   0x9   :  { %p75_p3 = scmp.ne.s32.totalorder %s16_s10, %s74_s18  ;;  %p80_p5 = scmp.lt.s32.totalorder %s74_s18, %s74_s18 }
   0xb   :  { %p81_p6 = por %p80_p5, %p79_p4 }
   0xd   :  { %p82_p7 = pnand %p81_p6, %p75_p3 }
   0xf   :  { %85 = shalt.err (!%p82_p7)
}
  0x10   :  { %18 = dma.hbm_to_vmem [thread:$0]  %s157_s0, 64, %s16_s10, [#allocation3]  }
  0x11   :  { %108 = dma.done.wait [#allocation3], 64  }
  0x12   :  { %109 = vsyncadd [#allocation3], 4294967232  ;;  %v27_v0 = vlaneseq  ;;  %v113_v1 = vmov 1983009808   ;;  %v25_v7 = vld [vmem:[%s158_s1] sm:$0x3] }
  0x13   :  { %v37_v2 = vunpack.c.l.s4 %v113_v1  ;;  %v24_v12 = vld [vmem:[#allocation2] sm:$0xf]  ;;  %s114_s23 = smov [#allocation5]  }
  0x14   :  { %v28_v3 = vshrl.u32 %v27_v0, 7  ;;  %s52_s0 = sshll.u32 %s114_s23, 4  ;;  %s53_s0 = int_to_ptr.vmem [resolvable:$true] %s52_s0 }
  0x15   :  { %v38_v6 = vunpack.c.0.s8 %v37_v2  ;;  %s86_s24 = scalar_lea.vmem %s53_s0, 64  ;;  %p91_p9 = scmp.lt.s32.totalorder %s53_s0, %s53_s0 }
  0x16   :  { %v29_v4 = vsub.s32 0, %v28_v3  ;;  %v33_v5 = vsub.s32 1, %v28_v3  ;;  %p87_p8 = scmp.ne.s32.totalorder %s53_s0, %s86_s24  ;;  %p92_p10 = scmp.lt.s32.totalorder %s86_s24, %s86_s24 }
  0x17   :  { %v41_v10 = vsub.s32 %v38_v6, %v28_v3 }
  0x18   :  { %v30_v8 = vrot.slane %v25_v7, %v29_v4  ;;  %v34_v9 = vrot.slane %v25_v7, %v33_v5  ;;  %p93_p11 = por %p92_p10, %p91_p9 }
  0x1a   :  { %v35_v11 = vcombine.low %v30_v8, %v34_v9  ;;  %p94_p12 = pnand %p93_p11, %p87_p8 }
  0x1c   :  { %v42_v13 = vrot.slane %v35_v11, %v41_v10 }
  0x1e   :  { %v44_v14 = vadd.f32 %v42_v13, %v24_v12 }
  0x20   :  { %45 = vst [vmem:[#allocation5] sm:$0xf] %v44_v14 }
  0x21   :  { %97 = shalt.err (!%p94_p12)
}
  0x22   :  { %s98_s26 = scalar_lea.hbm %s159_s2, 64 }
  0x23   :  { %p99_p13 = scmp.ne.s32.totalorder %s159_s2, %s98_s26  ;;  %p102_p0 = scmp.lt.u32.totalorder %s98_s26, %s159_s2 }
  0x25   :  { %p104_p1 = pnand %p102_p0, %p99_p13 }
  0x27   :  { %107 = shalt.err (!%p104_p1)
}
  0x28   :  { %55 = dma.vmem_to_hbm [thread:$0]  %s53_s0, 64, %s159_s2, [#allocation4]  }
  0x29   :  { %110 = dma.done.wait [#allocation4], 64  }
  0x2a   :  { %111 = vsyncadd [#allocation4], 4294967232 }
  0x2b   :  { %59 = vsyncpa [#allocation3], 1 }
  0x2c   :  { %60 = vsyncpa [#allocation4], 1 }

</bundles_post_ra>
